<compile_context>
chip_gen: v7x
topology: tpu7x:2x2x1
jax: 0.10.0
libtpu: 0.0.40
codegen_flags: <defaults>
</compile_context>

<pallas_src>
import functools

import jax
import jax.numpy as jnp
from jax.experimental import pallas as pl
from jax.experimental.pallas import tpu as pltpu


def _round_up(a, m):
    return (a + m - 1) // m * m


# ----------------------------- Pallas kernel ---------------------------------
def _convblock_kernel(x_ref, w1_ref, b1_ref, w2_ref, b2_ref, o_ref, h_ref, *,
                      Lt, T1r, k, p, L_true):
    """Fused conv1+bias+ReLU -> conv2+bias+ReLU for one (batch, L-tile) grid step.

    x_ref : (Lh_pad, K1)       per-batch packed im2col slab in h-space (resident across l)
    w1_ref: (K1, Cm_p)         layer-1 weights, taps*channels packed on the contraction dim
    b1_ref: (1, Cm_p)          layer-1 bias (f32)
    w2_ref: (k, Cm_p, Cout_p)  layer-2 per-tap weights
    b2_ref: (1, Cout_p)        layer-2 bias (f32)
    o_ref : (Lt, Cout_p)       output tile (lane-dense, bf16)
    h_ref : (T1r, Cm_p)        VMEM scratch: zero-padded intermediate activation (h-space)
    """
    l = pl.program_id(1)
    base = pl.multiple_of(l * Lt, 8)          # sublane-aligned start of this tile in h-space

    # ---- layer 1: one (T1r, k*C_in) @ (k*C_in, Cm_p) MXU matmul, f32 accumulation ----
    a1 = x_ref[pl.ds(base, T1r), :]                                       # (T1r, K1)
    acc1 = jnp.dot(a1, w1_ref[...], preferred_element_type=jnp.float32)   # (T1r, Cm_p) f32
    acc1 = jnp.maximum(acc1 + b1_ref[...], 0.0)

    # rows outside [p, p+L) are layer-2's zero padding; only edge tiles ever touch them
    needs_mask = jnp.logical_or(base < p, base + T1r > p + L_true)

    @pl.when(needs_mask)
    def _():
        jh = base + jax.lax.broadcasted_iota(jnp.int32, (T1r, 1), 0)
        valid = jnp.logical_and(jh >= p, jh < p + L_true)
        h_ref[...] = jnp.where(valid, acc1, 0.0).astype(h_ref.dtype)

    @pl.when(jnp.logical_not(needs_mask))
    def _():
        h_ref[...] = acc1.astype(h_ref.dtype)

    # ---- layer 2: k accumulating tap matmuls from the VMEM-resident h ----
    acc2 = jnp.dot(h_ref[pl.ds(0, Lt), :], w2_ref[0],
                   preferred_element_type=jnp.float32)                    # (Lt, Cout_p) f32
    for t in range(1, k):
        acc2 = acc2 + jnp.dot(h_ref[pl.ds(t, Lt), :], w2_ref[t],
                              preferred_element_type=jnp.float32)
    o_ref[...] = jnp.maximum(acc2 + b2_ref[...], 0.0).astype(o_ref.dtype)  # lane-dense bf16 store


# ----------------------------- wrapper ---------------------------------------
def _weight_norm_effective(v, g):
    """PyTorch weight_norm (dim=0): w[o] = g[o] * v[o] / ||v[o]||, v shape (O, I, K)."""
    norm = jnp.sqrt(jnp.sum(v * v, axis=(1, 2), keepdims=True))
    return (g.reshape(-1, 1, 1) / norm) * v


def convblock_forward(x_ncl, params, k, *, compute_dtype=jnp.bfloat16, l_tile=512):
    """x_ncl: (N, C_in, L) -> (N, C_out, L), matching the PyTorch module (padding='zero', dropout=0)."""
    assert k % 2 == 1, "only odd kernel sizes supported (PyTorch pad=k//2 keeps length)"
    N, C_in, L = x_ncl.shape
    C_out = params["b1"].shape[0]
    p = k // 2
    LANE = 128

    # effective conv weights (weight_norm folded in the wrapper; param-sized, negligible)
    w1 = _weight_norm_effective(params["v1"], params["g1"])      # (O, I, K)
    w2 = _weight_norm_effective(params["v2"], params["g2"])
    w1_kio = jnp.transpose(w1, (2, 1, 0))                        # (K, I, O)
    w2_kio = jnp.transpose(w2, (2, 1, 0))

    # geometry
    Cm_p = _round_up(C_out, LANE)            # intermediate / output lanes (lane-dense)
    Cout_p = Cm_p
    K1 = k * C_in                            # packed layer-1 contraction width (true, unpadded)
    Lt = min(_round_up(L, 8), _round_up(l_tile, 8))              # output rows per grid step
    L_pad = _round_up(L, Lt)
    n_l = L_pad // Lt
    T1 = Lt + 2 * p                          # h rows needed per tile (with halo)
    T1r = _round_up(T1, 8)
    Lh_pad = (L_pad - Lt) + T1r              # per-batch im2col slab rows (h-space)

    # NCL -> NLC, zero halo of 2p in front + tail zeros, then pack taps*channels into lanes.
    # x_im2col[n, jh, t*C_in + c] = x_zeropad[n, jh - 2p + t, c]  (true lane width, no 128-pad)
    x_nlc = jnp.transpose(x_ncl, (0, 2, 1)).astype(compute_dtype)
    Lfront = Lh_pad + (k - 1)
    x_front = jnp.pad(x_nlc, ((0, 0), (2 * p, Lfront - L - 2 * p), (0, 0)))
    x_im2col = jnp.concatenate([x_front[:, t:t + Lh_pad, :] for t in range(k)], axis=-1)

    # weights: layer-1 packed (k*C_in, Cm_p); layer-2 per-tap (k, Cm_p, Cout_p)
    w1_flat = jnp.pad(w1_kio.reshape(K1, C_out),
                      ((0, 0), (0, Cm_p - C_out))).astype(compute_dtype)
    w2_pad = jnp.pad(w2_kio, ((0, 0), (0, Cm_p - C_out), (0, Cout_p - C_out))
                     ).astype(compute_dtype)
    b1p = jnp.pad(params["b1"], (0, Cm_p - C_out)).reshape(1, Cm_p).astype(jnp.float32)
    b2p = jnp.pad(params["b2"], (0, Cout_p - C_out)).reshape(1, Cout_p).astype(jnp.float32)

    # VMEM budget (slab + output double-buffered, weights resident, f32 temps headroom)
    slab_b = Lh_pad * _round_up(K1, LANE) * 2
    w_b = _round_up(K1, 8) * Cm_p * 2 + k * Cm_p * Cout_p * 2 + (Cm_p + Cout_p) * 4
    out_b = Lt * Cout_p * 2
    h_b = T1r * Cm_p * 2
    tmp_b = (T1r * Cm_p + Lt * Cout_p) * 4 * 2
    est = 2 * slab_b + 2 * w_b + 2 * out_b + h_b + tmp_b
    vmem_limit = int(min(max(2 * est, 32 * 1024 * 1024), 100 * 1024 * 1024))

    kern = functools.partial(_convblock_kernel, Lt=Lt, T1r=T1r, k=k, p=p, L_true=L)
    out = pl.pallas_call(
        kern,
        out_shape=jax.ShapeDtypeStruct((N, L_pad, Cout_p), compute_dtype),
        grid_spec=pltpu.PrefetchScalarGridSpec(
            num_scalar_prefetch=0,
            grid=(N, n_l),
            in_specs=[
                # packed per-batch slab; index ignores l -> stays resident in VMEM across L tiles
                pl.BlockSpec((None, Lh_pad, K1), lambda n, l: (n, 0, 0)),
                pl.BlockSpec((K1, Cm_p), lambda n, l: (0, 0)),          # weights resident
                pl.BlockSpec((1, Cm_p), lambda n, l: (0, 0)),           # bias resident
                pl.BlockSpec((k, Cm_p, Cout_p), lambda n, l: (0, 0, 0)),
                pl.BlockSpec((1, Cout_p), lambda n, l: (0, 0)),
            ],
            out_specs=pl.BlockSpec((None, Lt, Cout_p), lambda n, l: (n, l, 0)),
            scratch_shapes=[pltpu.VMEM((T1r, Cm_p), compute_dtype)],    # intermediate h in VMEM
        ),
        compiler_params=pltpu.CompilerParams(
            dimension_semantics=("parallel", "parallel"),
            vmem_limit_bytes=vmem_limit,
        ),
    )(x_im2col, w1_flat, b1p, w2_pad, b2p)

    # drop L / lane padding, NLC -> NCL, restore caller dtype (one fused XLA op)
    y = out[:, :L, :C_out]
    return jnp.transpose(y, (0, 2, 1)).astype(x_ncl.dtype)


# ----------------------------- params & reference -----------------------------
def init_convblock_params(key, in_ch, out_ch, k):
    k1, k2, k3, k4 = jax.random.split(key, 4)
    v1 = 0.1 * jax.random.normal(k1, (out_ch, in_ch, k), jnp.float32)
    b1 = 0.05 * jax.random.normal(k2, (out_ch,), jnp.float32)
    v2 = 0.1 * jax.random.normal(k3, (out_ch, out_ch, k), jnp.float32)
    b2 = 0.05 * jax.random.normal(k4, (out_ch,), jnp.float32)
    # weight_norm init in torch sets g = ||v|| per output channel
    g1 = jnp.sqrt(jnp.sum(v1 * v1, axis=(1, 2)))
    g2 = jnp.sqrt(jnp.sum(v2 * v2, axis=(1, 2)))
    return dict(v1=v1, g1=g1, b1=b1, v2=v2, g2=g2, b2=b2)


def convblock_reference(x_ncl, params, k):
    w1 = _weight_norm_effective(params["v1"], params["g1"])
    w2 = _weight_norm_effective(params["v2"], params["g2"])
    pad = k // 2
    dn = ("NCH", "OIH", "NCH")

    def conv(x, w, b):
        y = jax.lax.conv_general_dilated(x, w, (1,), [(pad, pad)], dimension_numbers=dn)
        return jnp.maximum(y + b.reshape(1, -1, 1), 0.0)

    return conv(conv(x_ncl, w1, params["b1"]), w2, params["b2"])


# ---------------------------------- main --------------------------------------
if __name__ == "__main__":
    key = jax.random.PRNGKey(0)
    kx, kp, kx2, kp2, kx3, kp3 = jax.random.split(key, 6)

    # test 1: small shapes consistent with the module (single tile, k=3)
    N, in_ch, out_ch, L, k = 2, 4, 8, 16, 3
    x = jax.random.normal(kx, (N, in_ch, L), jnp.float32)   # PyTorch Conv1d input layout (N, C, L)
    params = init_convblock_params(kp, in_ch, out_ch, k)
    out = jax.block_until_ready(convblock_forward(x, params, k))
    ref = convblock_reference(x, params, k)
    assert out.shape == (N, out_ch, L), out.shape
    err = float(jnp.max(jnp.abs(out - ref)))
    assert jnp.allclose(out, ref, atol=1e-2, rtol=1e-2), err   # bf16 compute, f32 accumulation

    # test 2: multi-tile L grid with remainder padding, k=5, edge-tile masking
    N2, in2, out2, L2, k2 = 2, 4, 8, 40, 5
    x2 = jax.random.normal(kx2, (N2, in2, L2), jnp.float32)
    params2 = init_convblock_params(kp2, in2, out2, k2)
    out2_ = jax.block_until_ready(convblock_forward(x2, params2, k2, l_tile=16))
    ref2 = convblock_reference(x2, params2, k2)
    assert out2_.shape == (N2, out2, L2), out2_.shape
    err2 = float(jnp.max(jnp.abs(out2_ - ref2)))
    assert jnp.allclose(out2_, ref2, atol=1e-2, rtol=1e-2), err2

    # test 3: default 512-row tile, interior (unmasked) tile path exercised
    N3, in3, out3, L3, k3 = 2, 4, 8, 1200, 3
    x3 = jax.random.normal(kx3, (N3, in3, L3), jnp.float32)
    params3 = init_convblock_params(kp3, in3, out3, k3)
    out3_ = jax.block_until_ready(convblock_forward(x3, params3, k3))
    ref3 = convblock_reference(x3, params3, k3)
    assert out3_.shape == (N3, out3, L3), out3_.shape
    err3 = float(jnp.max(jnp.abs(out3_ - ref3)))
    assert jnp.allclose(out3_, ref3, atol=1e-2, rtol=1e-2), err3

    print("KERNEL_OK")
</pallas_src>

<mosaic_0001>
module attributes {stable_mosaic.version = 11 : i64} {
  func.func @_convblock_kernel(%arg0: i32, %arg1: i32, %arg2: memref<1x24x12xbf16, #tpu.memory_space<vmem>>, %arg3: memref<12x128xbf16, #tpu.memory_space<vmem>>, %arg4: memref<1x128xf32, #tpu.memory_space<vmem>>, %arg5: memref<3x128x128xbf16, #tpu.memory_space<vmem>>, %arg6: memref<1x128xf32, #tpu.memory_space<vmem>>, %arg7: memref<1x16x128xbf16, #tpu.memory_space<vmem>>, %arg8: memref<24x128xbf16, #tpu.memory_space<vmem>>) attributes {dimension_semantics = [#tpu.dimension_semantics<parallel>, #tpu.dimension_semantics<parallel>], iteration_bounds = array<i64: 2, 1>, scalar_prefetch = 0 : i64, scratch_operands = 1 : i64, tpu.core_type = #tpu.core_type<tc>, window_params = [{transform_indices = @transform_0, window_bounds = array<i64: 1, 24, 12>}, {pipeline_mode = #tpu.pipeline_mode<synchronous>, transform_indices = @transform_1, window_bounds = array<i64: 12, 128>}, {pipeline_mode = #tpu.pipeline_mode<synchronous>, transform_indices = @transform_2, window_bounds = array<i64: 1, 128>}, {pipeline_mode = #tpu.pipeline_mode<synchronous>, transform_indices = @transform_3, window_bounds = array<i64: 3, 128, 128>}, {pipeline_mode = #tpu.pipeline_mode<synchronous>, transform_indices = @transform_4, window_bounds = array<i64: 1, 128>}, {transform_indices = @transform_5, window_bounds = array<i64: 1, 16, 128>}]} {
    %c16_i32 = arith.constant 16 : i32
    %0 = arith.muli %arg1, %c16_i32 : i32
    %1 = tpu.assume_multiple %0, 8 : i32
    %c0 = arith.constant 0 : index
    %2 = arith.index_cast %1 : i32 to index
    %c0_0 = arith.constant 0 : index
    %3 = vector.load %arg2[%c0, %2, %c0_0] : memref<1x24x12xbf16, #tpu.memory_space<vmem>>, vector<1x24x12xbf16>
    %4 = vector.shape_cast %3 : vector<1x24x12xbf16> to vector<24x12xbf16>
    %c0_1 = arith.constant 0 : index
    %c0_2 = arith.constant 0 : index
    %5 = vector.load %arg3[%c0_1, %c0_2] : memref<12x128xbf16, #tpu.memory_space<vmem>>, vector<12x128xbf16>
    %cst = arith.constant dense<0.000000e+00> : vector<24x128xf32>
    %6 = tpu.matmul %4, %5, %cst {dimension_numbers = #tpu.dot_dimension_numbers<[1], [0], [0], [1], [0, 0, 1, 1], [], []>} : vector<24x12xbf16>, vector<12x128xbf16>, vector<24x128xf32> -> vector<24x128xf32>
    %c0_3 = arith.constant 0 : index
    %c0_4 = arith.constant 0 : index
    %7 = vector.load %arg4[%c0_3, %c0_4] : memref<1x128xf32, #tpu.memory_space<vmem>>, vector<1x128xf32>
    %8 = vector.broadcast %7 : vector<1x128xf32> to vector<24x128xf32>
    %9 = arith.addf %6, %8 : vector<24x128xf32>
    %cst_5 = arith.constant 0.000000e+00 : f32
    %10 = vector.broadcast %cst_5 : f32 to vector<24x128xf32>
    %11 = arith.maximumf %9, %10 : vector<24x128xf32>
    %c1_i32 = arith.constant 1 : i32
    %12 = arith.cmpi slt, %1, %c1_i32 : i32
    %c24_i32 = arith.constant 24 : i32
    %13 = arith.addi %1, %c24_i32 : i32
    %c17_i32 = arith.constant 17 : i32
    %14 = arith.cmpi sgt, %13, %c17_i32 : i32
    %15 = arith.ori %12, %14 : i1
    %16 = arith.extui %15 : i1 to i32
    %c0_i32 = arith.constant 0 : i32
    %17 = arith.cmpi ne, %16, %c0_i32 : i32
    scf.if %17 {
      %44 = tpu.iota {dimensions = array<i32: 0>} : vector<24x1xi32>
      %45 = vector.broadcast %1 : i32 to vector<24x1xi32>
      %46 = arith.addi %45, %44 : vector<24x1xi32>
      %c1_i32_29 = arith.constant 1 : i32
      %47 = vector.broadcast %c1_i32_29 : i32 to vector<24x1xi32>
      %48 = arith.cmpi sge, %46, %47 : vector<24x1xi32>
      %c17_i32_30 = arith.constant 17 : i32
      %49 = vector.broadcast %c17_i32_30 : i32 to vector<24x1xi32>
      %50 = arith.cmpi slt, %46, %49 : vector<24x1xi32>
      %51 = arith.andi %48, %50 : vector<24x1xi1>
      %cst_31 = arith.constant 0.000000e+00 : f32
      %52 = vector.shape_cast %51 : vector<24x1xi1> to vector<24x1xi1>
      %53 = vector.broadcast %52 : vector<24x1xi1> to vector<24x128xi1>
      %54 = vector.broadcast %cst_31 : f32 to vector<24x128xf32>
      %55 = arith.select %53, %11, %54 : vector<24x128xi1>, vector<24x128xf32>
      %56 = arith.truncf %55 : vector<24x128xf32> to vector<24x128xbf16>
      %c0_32 = arith.constant 0 : index
      %c0_33 = arith.constant 0 : index
      %57 = vector.load %arg8[%c0_32, %c0_33] : memref<24x128xbf16, #tpu.memory_space<vmem>>, vector<24x128xbf16>
      tpu.vector_store %arg8[%c0_32, %c0_33], %56 {strides = array<i32>} : memref<24x128xbf16, #tpu.memory_space<vmem>>, vector<24x128xbf16>,
    } else {
    }
    %true = arith.constant true
    %18 = arith.xori %15, %true : i1
    %19 = arith.extui %18 : i1 to i32
    %c0_i32_6 = arith.constant 0 : i32
    %20 = arith.cmpi ne, %19, %c0_i32_6 : i32
    scf.if %20 {
      %44 = arith.truncf %11 : vector<24x128xf32> to vector<24x128xbf16>
      %c0_29 = arith.constant 0 : index
      %c0_30 = arith.constant 0 : index
      %45 = vector.load %arg8[%c0_29, %c0_30] : memref<24x128xbf16, #tpu.memory_space<vmem>>, vector<24x128xbf16>
      tpu.vector_store %arg8[%c0_29, %c0_30], %44 {strides = array<i32>} : memref<24x128xbf16, #tpu.memory_space<vmem>>, vector<24x128xbf16>,
    } else {
    }
    %c0_7 = arith.constant 0 : index
    %c0_8 = arith.constant 0 : index
    %21 = vector.load %arg8[%c0_7, %c0_8] : memref<24x128xbf16, #tpu.memory_space<vmem>>, vector<16x128xbf16>
    %c0_9 = arith.constant 0 : index
    %c0_10 = arith.constant 0 : index
    %c0_11 = arith.constant 0 : index
    %22 = vector.load %arg5[%c0_9, %c0_10, %c0_11] : memref<3x128x128xbf16, #tpu.memory_space<vmem>>, vector<1x128x128xbf16>
    %23 = vector.shape_cast %22 : vector<1x128x128xbf16> to vector<128x128xbf16>
    %cst_12 = arith.constant dense<0.000000e+00> : vector<16x128xf32>
    %24 = tpu.matmul %21, %23, %cst_12 {dimension_numbers = #tpu.dot_dimension_numbers<[1], [0], [0], [1], [0, 0, 1, 1], [], []>} : vector<16x128xbf16>, vector<128x128xbf16>, vector<16x128xf32> -> vector<16x128xf32>
    %c1 = arith.constant 1 : index
    %c0_13 = arith.constant 0 : index
    %25 = vector.load %arg8[%c1, %c0_13] : memref<24x128xbf16, #tpu.memory_space<vmem>>, vector<16x128xbf16>
    %c1_14 = arith.constant 1 : index
    %c0_15 = arith.constant 0 : index
    %c0_16 = arith.constant 0 : index
    %26 = vector.load %arg5[%c1_14, %c0_15, %c0_16] : memref<3x128x128xbf16, #tpu.memory_space<vmem>>, vector<1x128x128xbf16>
    %27 = vector.shape_cast %26 : vector<1x128x128xbf16> to vector<128x128xbf16>
    %cst_17 = arith.constant dense<0.000000e+00> : vector<16x128xf32>
    %28 = tpu.matmul %25, %27, %cst_17 {dimension_numbers = #tpu.dot_dimension_numbers<[1], [0], [0], [1], [0, 0, 1, 1], [], []>} : vector<16x128xbf16>, vector<128x128xbf16>, vector<16x128xf32> -> vector<16x128xf32>
    %29 = arith.addf %24, %28 : vector<16x128xf32>
    %c2 = arith.constant 2 : index
    %c0_18 = arith.constant 0 : index
    %30 = vector.load %arg8[%c2, %c0_18] : memref<24x128xbf16, #tpu.memory_space<vmem>>, vector<16x128xbf16>
    %c2_19 = arith.constant 2 : index
    %c0_20 = arith.constant 0 : index
    %c0_21 = arith.constant 0 : index
    %31 = vector.load %arg5[%c2_19, %c0_20, %c0_21] : memref<3x128x128xbf16, #tpu.memory_space<vmem>>, vector<1x128x128xbf16>
    %32 = vector.shape_cast %31 : vector<1x128x128xbf16> to vector<128x128xbf16>
    %cst_22 = arith.constant dense<0.000000e+00> : vector<16x128xf32>
    %33 = tpu.matmul %30, %32, %cst_22 {dimension_numbers = #tpu.dot_dimension_numbers<[1], [0], [0], [1], [0, 0, 1, 1], [], []>} : vector<16x128xbf16>, vector<128x128xbf16>, vector<16x128xf32> -> vector<16x128xf32>
    %34 = arith.addf %29, %33 : vector<16x128xf32>
    %c0_23 = arith.constant 0 : index
    %c0_24 = arith.constant 0 : index
    %35 = vector.load %arg6[%c0_23, %c0_24] : memref<1x128xf32, #tpu.memory_space<vmem>>, vector<1x128xf32>
    %36 = vector.broadcast %35 : vector<1x128xf32> to vector<16x128xf32>
    %37 = arith.addf %34, %36 : vector<16x128xf32>
    %cst_25 = arith.constant 0.000000e+00 : f32
    %38 = vector.broadcast %cst_25 : f32 to vector<16x128xf32>
    %39 = arith.maximumf %37, %38 : vector<16x128xf32>
    %40 = arith.truncf %39 : vector<16x128xf32> to vector<16x128xbf16>
    %c0_26 = arith.constant 0 : index
    %c0_27 = arith.constant 0 : index
    %c0_28 = arith.constant 0 : index
    %41 = vector.load %arg7[%c0_26, %c0_27, %c0_28] : memref<1x16x128xbf16, #tpu.memory_space<vmem>>, vector<1x16x128xbf16>
    %42 = vector.shape_cast %41 : vector<1x16x128xbf16> to vector<16x128xbf16>
    %43 = vector.shape_cast %40 : vector<16x128xbf16> to vector<1x16x128xbf16>
    tpu.vector_store %arg7[%c0_26, %c0_27, %c0_28], %43 {strides = array<i32>} : memref<1x16x128xbf16, #tpu.memory_space<vmem>>, vector<1x16x128xbf16>,
    return
  }
  func.func @transform_0(%arg0: i32, %arg1: i32) -> (i32, i32, i32) {
    %c0_i32 = arith.constant 0 : i32
    %c0_i32_0 = arith.constant 0 : i32
    %c0_i32_1 = arith.constant 0 : i32
    return %arg0, %c0_i32, %c0_i32_0 : i32, i32, i32
  }
  func.func @transform_1(%arg0: i32, %arg1: i32) -> (i32, i32) {
    %c0_i32 = arith.constant 0 : i32
    %c0_i32_0 = arith.constant 0 : i32
    %c0_i32_1 = arith.constant 0 : i32
    return %c0_i32, %c0_i32_0 : i32, i32
  }
  func.func @transform_2(%arg0: i32, %arg1: i32) -> (i32, i32) {
    %c0_i32 = arith.constant 0 : i32
    %c0_i32_0 = arith.constant 0 : i32
    %c0_i32_1 = arith.constant 0 : i32
    return %c0_i32, %c0_i32_0 : i32, i32
  }
  func.func @transform_3(%arg0: i32, %arg1: i32) -> (i32, i32, i32) {
    %c0_i32 = arith.constant 0 : i32
    %c0_i32_0 = arith.constant 0 : i32
    %c0_i32_1 = arith.constant 0 : i32
    %c0_i32_2 = arith.constant 0 : i32
    return %c0_i32, %c0_i32_0, %c0_i32_1 : i32, i32, i32
  }
  func.func @transform_4(%arg0: i32, %arg1: i32) -> (i32, i32) {
    %c0_i32 = arith.constant 0 : i32
    %c0_i32_0 = arith.constant 0 : i32
    %c0_i32_1 = arith.constant 0 : i32
    return %c0_i32, %c0_i32_0 : i32, i32
  }
  func.func @transform_5(%arg0: i32, %arg1: i32) -> (i32, i32, i32) {
    %c0_i32 = arith.constant 0 : i32
    %c0_i32_0 = arith.constant 0 : i32
    return %arg0, %arg1, %c0_i32 : i32, i32, i32
  }
}

</mosaic_0001>

<bundles_post_ra>
// kernel: tpu_custom_call.1
= control target key start
LH: loop header
LB: loop body
LE: loop exit
PB: predicated region body
PF: predicated region fallthrough
CT: control target
= control target key end

     0   :  { %10 = vsyncpa [#allocation4], 0  ;;  %s1518_s0 = inlined_call_operand.vmem [shape: bf16[2,24,12], index: 0, kind: input, shape index: {}]   ;;  %s1519_s1 = inlined_call_operand.vmem [shape: bf16[12,128], index: 1, kind: input, shape index: {}]   ;;  %s1520_s2 = inlined_call_operand.vmem [shape: f32[1,128], index: 2, kind: input, shape index: {}]   ;;  %s1521_s3 = inlined_call_operand.hbm [shape: bf16[3,128,128], index: 3, kind: input, shape index: {}]   ;;  %s1522_s4 = inlined_call_operand.vmem [shape: f32[1,128], index: 4, kind: input, shape index: {}]   ;;  %s1523_s5 = inlined_call_operand.hbm [shape: bf16[2,16,128], index: 5, kind: output, shape index: {}]  }
   0x1   :  { %11 = vsyncpa [#allocation5], 0 }
   0x2   :  { %13 = vsyncpa [#allocation5 + $0x1], 0  ;;  %s1326_s18 = smov 0   ;;  %s1328_s19 = smov 0  }
   0x3   :  { %s1330_s20 = smov 0   ;;  %s1332_s21 = smov 0  }
   0x4   :  { %s1334_s22 = smov 0   ;;  %s1336_s23 = smov 0  }
   0x5 LB: > { %s899_s24 = sadd.s32 4294967295, %s1286_s23   ;;  %s900_s25 = sadd.s32 4294967294, %s1286_s23   ;;  %s1286_s23 = sphi %s1336_s23, %s19_s23   ;;  %s1282_s22 = sphi %s1334_s22, %s1541_s22   ;;  %s1278_s21 = sphi %s1332_s21, %s1540_s21   ;;  %s1274_s20 = sphi %s1330_s20, %s1539_s20   ;;  %s1270_s19 = sphi %s1328_s19, %s1538_s19   ;;  %s1266_s18 = sphi %s1326_s18, %s1537_s18  }
   0x6   : > { %s31_s26 = sadd.s32 1, %s1282_s22  ;;  %s150_s27 = sadd.s32 1, %s1274_s20 }
   0x7   : > { %p33_p0 = scmp.ge.s32.totalorder %s31_s26, 2  ;;  %p160_p1 = scmp.ne.s32.totalorder %s1274_s20, %s1270_s19 }
   0x8   : > { %p161_p2 = scmp.eq.s32.totalorder %s899_s24, 1  ;;  %p166_p3 = scmp.ne.s32.totalorder %s1270_s19, %s1266_s18 }
   0x9   : > { %s1543_s26 = smov (%p33_p0, %s31_s26), 0  ;;  %p167_p5 = scmp.eq.s32.totalorder %s900_s25, 1 }
   0xa   : > { %p1366_p4 = por %p161_p2, %p160_p1  ;;  %s145_s29 = ssub.s32 %s1282_s22, %s1543_s26 }
   0xb   : > { %p901_p6 = scmp.ge.s32.totalorder %s1286_s23, 1  ;;  %p148_p7 = scmp.eq.s32.totalorder %s145_s29, 0 }
   0xc   : > { %s1528_s28 = scalar_select %p1366_p4, 1, 0 }
   0xd   : > { %p1373_p8 = por %p167_p5, %p166_p3  ;;  %p174_p9 = scmp.lt.s32.totalorder %s1286_s23, 3 }
   0xe   : > { %s1379_s6 = scalar_select %p148_p7, %s1274_s20, %s150_s27  }
   0xf   : > { %s1529_s30 = scalar_select %p1373_p8, 1, 0 }
  0x10   : > { %p1381_p10 = pnand %p901_p6, %p174_p9  ;;  %p1385_p11 = scmp.eq.s32.totalorder %s899_s24, 0 }
  0x11   : > { %s1288_s9 = smov [#allocation3]   ;;  %s1176_s14 = scalar_lea.hbm %s1521_s3, 3072 }
  0x12   : > { %s1530_s7 = scalar_select %p1381_p10, 1, 0 }
  0x13   : > { %s1531_s8 = scalar_select %p1385_p11, 1, 0 }
  0x14   : > { %p1079_p12 = pneg %p1381_p10  ;;  %s192_s10 = sshll.u32 %s1288_s9, 4  ;;  %s193_s10 = int_to_ptr.vmem [resolvable:$true] %s192_s10 }
  0x15   : > { %p1177_p0 = scmp.ne.s32.totalorder %s1521_s3, %s1176_s14  ;;  %p1183_p5 = scmp.lt.u32.totalorder %s1176_s14, %s1521_s3 }
  0x16   : > { %p1393_p13 = pnand %p1385_p11, %p1079_p12 }
  0x18   : > { %p1178_p1 = pneg %p1393_p13 }
  0x1a   : > { %p1179_p2 = pnand %p1178_p1, %p1177_p0 }
  0x1c   : > { %p1180_p3 = pneg %p1179_p2 }
  0x1e   : > { %p1185_p6 = pnand %p1183_p5, %p1180_p3 }
  0x20   : > { %1188 = shalt.err (!%p1185_p6)
}
  0x21   : > { %s1189_s25 = scalar_lea.vmem %s193_s10, 3072  ;;  %p1197_p8 = scmp.lt.s32.totalorder %s193_s10, %s193_s10 }
  0x22   : > { %p1190_p7 = scmp.ne.s32.totalorder %s193_s10, %s1189_s25  ;;  %p1198_p4 = scmp.lt.s32.totalorder %s1189_s25, %s1189_s25 }
  0x24   : > { %p1192_p9 = pnand %p1190_p7, %p1178_p1  ;;  %p1199_p11 = por %p1198_p4, %p1197_p8 }
  0x26   : > { %p1193_p12 = pneg %p1192_p9 }
  0x28   : > { %p1200_p10 = pnand %p1199_p11, %p1193_p12 }
  0x2a   : > { %1203 = shalt.err (!%p1200_p10)
}
  0x2b   : > { %s1289_s27 = smov 64   ;;  %s1290_s29 = smov 4  }
  0x2c   : > { %1082 = dma.hbm_to_vmem [thread:$0]  (!%p1393_p13), %s1521_s3, 3072, %s193_s10, [#allocation4], %s1289_s27, %s1289_s27, %s1290_s29  }
  0x2d   : > { %p1533_p0 = scmp.ne.s32.totalorder %s1530_s7, 0 }
  0x2e   : > { %p1534_p2 = scmp.ne.s32.totalorder (!%p1533_p0), %s1531_s8, 0 }
  0x2f   : > { %219 = sbr.rel (%p1533_p0) target bundleno = 572 (0x23c), region = 40 }
  0x36   : > { %1257 = dma.done.wait (%p1534_p2), [#allocation4], 3072  }
  0x37   : > { %1259 = vsyncadd (%p1534_p2), [#allocation4], 4294964224  ;;  %p247_p4 = scmp.lt.s32.totalorder %s1278_s21, 1  ;;  %v1291_v0 = vmov 0.0   ;;  %vm291_vm0 = vcmask 1045504   ;;  %vm284_vm1 = vcmask 97280   ;;  %v353_v21 = vlaneseq }
  0x38   : > { %1011 = vmatprep.subr.bf16.mxu1 %v1291_v0  ;;  %v1145_v1 = vld [vmem:[%s1519_s1] sm:$0x3f]   ;;  %v1148_v5 = vld [vmem:[#allocation3] sm:$0xff]   ;;  %v1149_v7 = vld [vmem:[#allocation3 + $0x8] sm:$0xff]   ;;  %vm1292_vm2 = vmmov 0   ;;  %vm679_vm6 = vcmask 1046528  }
  0x39   : > { %s248_s11 = scalar_select %p247_p4, %s1278_s21, 1  ;;  %1071 = vmatprep.subr.msk.bf16.mxu0 %vm291_vm0, %v1145_v1  ;;  %v293_v2 = vsel %vm291_vm0, %v1145_v1, 0  ;;  %v1150_v6 = vld [vmem:[#allocation3 + $0x40] sm:$0xff]   ;;  %v1152_v8 = vld [vmem:[#allocation3 + $0x48] sm:$0xff]   ;;  %v1151_v9 = vld [vmem:[#allocation3 + $0x10] sm:$0xff]   ;;  %1027 = vmatprep.mubr.msk.bf16.mxu1 %vm1292_vm2, %v1291_v0  ;;  %v354_v22 = vshrl.u32 %v353_v21, 7 }
  0x3a   : > { %1006 = vmatpush3.bf16.msra.mxu0 %v293_v2  ;;  %1012 = vmatpush3.bf16.msra.mxu1 %v1150_v6  ;;  %v1153_v10 = vld [vmem:[#allocation3 + $0x18] sm:$0xff]   ;;  %v1154_v11 = vld [vmem:[#allocation3 + $0x50] sm:$0xff]   ;;  %v1155_v12 = vld [vmem:[#allocation3 + $0x20] sm:$0xff]   ;;  %vm460_vm5 = vsmask.f32 7424  ;;  %s244_s24 = sand.u32 1, %s1270_s19  }
  0x3b   : > { %s1072_s13 = smul.u32 12, %s248_s11  ;;  %1031 = vmatprep.subr.bf16.mxu0 %v1291_v0  ;;  %1013 = vmatprep.subr.bf16.mxu1 %v1291_v0  ;;  %v1156_v13 = vld [vmem:[#allocation3 + $0x58] sm:$0xff]   ;;  %v1157_v14 = vld [vmem:[#allocation3 + $0x28] sm:$0xff]   ;;  %v1158_v15 = vld [vmem:[#allocation3 + $0x60] sm:$0xff]   ;;  %v356_v24 = vadd.s32 16, %v354_v22  ;;  %vm361_vm4 = vcmp.ge.s32.totalorder %v354_v22, 1 }
  0x3c   : > { %v1159_v16 = vld [vmem:[#allocation3 + $0x30] sm:$0xff]   ;;  %v1160_v17 = vld [vmem:[#allocation3 + $0x68] sm:$0xff]   ;;  %v1161_v18 = vld [vmem:[#allocation3 + $0x38] sm:$0xff]   ;;  %s906_s25 = sshll.u32 %s244_s24, 3  ;;  %s964_s9 = sshll.u32 %s1278_s21, 7 }
  0x3d   : > { %s251_s7 = scalar_lea.vmem %s1518_s0, %s1072_s13  ;;  %v1162_v19 = vld [vmem:[#allocation3 + $0x70] sm:$0xff]   ;;  %v1164_v20 = vld [vmem:[#allocation3 + $0x78] sm:$0xff]   ;;  %vm366_vm3 = vcmp.lt.s32.totalorder %v356_v24, 17  ;;  %v1167_v50 = vld [vmem:[#allocation3 + $0x80] sm:$0xff]   ;;  %s246_s12 = scalar_lea.vmem [#allocation6], %s906_s25 }
  0x3e   : > { %v1146_v3 = vld [vmem:[%s251_s7] sm:$0xff]   ;;  %v1147_v4 = vld [vmem:[%s251_s7 + $0x8] ss:$0 sps:$4 sm:$0xff]   ;;  %1014 = vmatpush3.bf16.msra.mxu1 %v1152_v8  ;;  %v1168_v52 = vld [vmem:[#allocation3 + $0x88] sm:$0xff]   ;;  %s812_s11 = sshll.u32 %s246_s12, 4  ;;  %s1468_s10 = scalar_lea.hbm %s1523_s5, %s964_s9  ;;  %s1470_s11 = int_to_ptr.vmem [resolvable:$true] %s812_s11 }
  0x3f   : > { %1007 = vmatprep.mubr.msk.bf16.mxu0 %vm284_vm1, %v1146_v3  ;;  %1015 = vmatprep.subr.bf16.mxu1 %v1291_v0  ;;  %v908_v23 = vld [vmem:[%s1520_s2] ss:$0 sm:$0xff]  ;;  %v1170_v54 = vld [vmem:[#allocation3 + $0x98] sm:$0xff]   ;;  %v1171_v55 = vld [vmem:[#allocation3 + $0xa0] sm:$0xff]   ;;  %s1472_s7 = scalar_lea.sflag [#allocation5], %s244_s24  ;;  %s1204_s15 = scalar_lea.vmem %s1470_s11, 128 }
  0x40   : > { %1008 = vmatmul.mubr.msk.bf16.vlgmr.msra.gmra.mrb[0].mxu0 %vm284_vm1, %v1147_v4  ;;  %v1169_v53 = vld [vmem:[#allocation3 + $0x90] sm:$0xff]   ;;  %v1172_v56 = vld [vmem:[#allocation3 + $0xa8] sm:$0xff]   ;;  %v1174_v60 = vld [vmem:[#allocation3 + $0xb8] sm:$0xff]   ;;  %p1205_p8 = scmp.ne.s32.totalorder %s1470_s11, %s1204_s15  ;;  %p1535_p10 = scmp.ne.s32.totalorder %s1528_s28, 0 }
  0x41   : > { %1032 = vmatpush3.bf16.msra.mxu0 %v1148_v5  ;;  %1047 = vmatprep.mubr.msk.bf16.mxu0 %vm1292_vm2, %v1291_v0  ;;  %v1173_v58 = vld [vmem:[#allocation3 + $0xb0] sm:$0xff]   ;;  %s1293_s21 = smov [#allocation6]  }
  0x42   : > { %1033 = vmatprep.subr.bf16.mxu0 %v1291_v0  ;;  %1016 = vmatpush3.bf16.msra.mxu1 %v1154_v11  ;;  %v948_v11 = vld [vmem:[%s1522_s4] ss:$0 sm:$0xff]  ;;  %p1206_p11 = pnand %p1205_p8, %p1535_p10  ;;  %s1208_s16 = sshll.u32 %s1293_s21, 4  ;;  %s1209_s16 = int_to_ptr.vmem [resolvable:$false] %s1208_s16 }
  0x43   : > { %1017 = vmatprep.subr.bf16.mxu1 %v1291_v0  ;;  %s1210_s8 = scalar_lea.vmem %s1209_s16, 256  ;;  %p1211_p1 = scmp.lt.s32.totalorder %s1470_s11, %s1209_s16 }
  0x44   : > { %p1207_p13 = pneg %p1206_p11  ;;  %p1212_p3 = scmp.lt.s32.totalorder %s1210_s8, %s1204_s15 }
  0x45   : > { %1034 = vmatpush3.bf16.msra.mxu0 %v1149_v7 }
  0x46   : > { %1035 = vmatprep.subr.bf16.mxu0 %v1291_v0  ;;  %1018 = vmatpush3.bf16.msra.mxu1 %v1156_v13  ;;  %p1213_p5 = por %p1212_p3, %p1211_p1 }
  0x47   : > { %1019 = vmatprep.subr.bf16.mxu1 %v1291_v0 }
  0x48   : > { %p1214_p6 = pnand %p1213_p5, %p1207_p13 }
  0x49   : > { %1036 = vmatpush3.bf16.msra.mxu0 %v1151_v9 }
  0x4a   : > { %1037 = vmatprep.subr.bf16.mxu0 %v1291_v0  ;;  %1020 = vmatpush3.bf16.msra.mxu1 %v1158_v15 }
  0x4b   : > { %1021 = vmatprep.subr.bf16.mxu1 %v1291_v0 }
  0x4d   : > { %1038 = vmatpush3.bf16.msra.mxu0 %v1153_v10 }
  0x4e   : > { %1039 = vmatprep.subr.bf16.mxu0 %v1291_v0  ;;  %1022 = vmatpush3.bf16.msra.mxu1 %v1160_v17 }
  0x4f   : > { %1023 = vmatprep.subr.bf16.mxu1 %v1291_v0 }
  0x51   : > { %1040 = vmatpush3.bf16.msra.mxu0 %v1155_v12 }
  0x52   : > { %1041 = vmatprep.subr.bf16.mxu0 %v1291_v0  ;;  %1024 = vmatpush3.bf16.msra.mxu1 %v1162_v19 }
  0x53   : > { %1025 = vmatprep.subr.bf16.mxu1 %v1291_v0 }
  0x55   : > { %1042 = vmatpush3.bf16.msra.mxu0 %v1157_v14 }
  0x56   : > { %1043 = vmatprep.subr.bf16.mxu0 %v1291_v0  ;;  %1026 = vmatpush3.bf16.msra.mxu1 %v1164_v20 }
  0x57   : > { %1051 = vmatprep.subr.bf16.mxu1 %v1291_v0 }
  0x59   : > { %1044 = vmatpush3.bf16.msra.mxu0 %v1159_v16 }
  0x5a   : > { %1045 = vmatprep.subr.bf16.mxu0 %v1291_v0 }
  0x5d   : > { %1046 = vmatpush3.bf16.msra.mxu0 %v1161_v18 }
 0x113   : > { %v1009_v25 = vpop.f32.mrb[0].mxu0 }
 0x114   : > { %v338_v26 = vadd.f32 %v1009_v25, %v908_v23  ;;  %v329_v27 = vpop.f32.mrb[1].mxu0 }
 0x115   : > { %v330_v28 = vadd.f32 %v908_v23, %v329_v27  ;;  %v1010_v29 = vpop.f32.mrb[2].mxu0 }
 0x116   : > { %v345_v30 = vmax.f32 %v338_v26, 0.0  ;;  %v332_v31 = vpop.f32.mrb[3].mxu0 }
 0x117   : > { %v343_v32 = vmax.f32 %v330_v28, 0.0  ;;  %v333_v33 = vadd.f32 %v908_v23, %v332_v31 }
 0x118   : > { %v378_v34 = vsel %vm366_vm3, %v345_v30, 0.0 }
 0x119   : > { %v958_v35 = vpack.c.bf16 %v378_v34, %v378_v34  ;;  %v376_v36 = vsel %vm361_vm4, %v343_v32, 0.0  ;;  %v344_v37 = vmax.f32 %v333_v33, 0.0 }
 0x11b   : > { %394 = vst [vmem:[#allocation2 + $0x8] sm:$0xf] %v958_v35  ;;  %v968_v38 = vpack.c.bf16 %v344_v37, %v376_v36 }
 0x11d   : > { %969 = vst [vmem:[#allocation2] sm:$0xff] %v968_v38  }
 0x122   : > { %v1166_v39 = vld [vmem:[#allocation2 + $0x8] ss:$0 sps:$4 sm:$0x11]  }
 0x123   : > { %v469_v45 = vshll.u32 %v1166_v39, 16  ;;  %v681_v62 = vrot.slane %v1166_v39, 1 }
 0x124   : > { %v1163_v40 = vld [vmem:[#allocation2] sm:$0xff]  }
 0x125   : > { %v432_v41 = vld [vmem:[#allocation2] sm:$0xf]  ;;  %v433_v42 = vld [vmem:[#allocation2 + $0x4] sm:$0xf]  ;;  %1048 = vmatmul.mubr.bf16.vlgmr.msra.gmra.mrb[4].mxu0 %v1163_v40  ;;  %v471_v49 = vrot.slane %v469_v45, 1 }
 0x126   : > { %v920_v43 = vcombine.low %v432_v41, %v433_v42  ;;  %v658_v57 = vld [vmem:[#allocation2] sm:$0xe] }
 0x127   : > { %v939_v59 = vcombine.low %v658_v57, %v433_v42 }
 0x128   : > { %v464_v44 = vshll.u32 %v920_v43, 16  ;;  %v462_v46 = vshrl.u32 %v920_v43, 16 }
 0x129   : > { %v680_v61 = vrot.slane %v939_v59, 1 }
 0x12a   : > { %v466_v47 = vrot.slane %v464_v44, 1 }
 0x12b   : > { %v682_v63 = vsel %vm679_vm6, %v680_v61, %v681_v62 }
 0x12c   : > { %v467_v48 = vor.u32 %v466_v47, %v462_v46 }
 0x12e   : > { %v472_v51 = vsel %vm460_vm5, %v467_v48, %v471_v49 }
 0x12f   : > { %1028 = vmatmul.mubr.bf16.vlgmr.msra.gmra.mrb[0].mxu1 %v472_v51 }
 0x130   : > { %1052 = vmatpush3.bf16.msra.mxu1 %v1167_v50  ;;  %1067 = vmatprep.mubr.msk.bf16.mxu1 %vm1292_vm2, %v1291_v0 }
 0x131   : > { %1053 = vmatprep.subr.bf16.mxu1 %v1291_v0 }
 0x134   : > { %1054 = vmatpush3.bf16.msra.mxu1 %v1168_v52 }
 0x135   : > { %1055 = vmatprep.subr.bf16.mxu1 %v1291_v0 }
 0x138   : > { %1056 = vmatpush3.bf16.msra.mxu1 %v1169_v53 }
 0x139   : > { %1057 = vmatprep.subr.bf16.mxu1 %v1291_v0 }
 0x13c   : > { %1058 = vmatpush3.bf16.msra.mxu1 %v1170_v54 }
 0x13d   : > { %1059 = vmatprep.subr.bf16.mxu1 %v1291_v0 }
 0x140   : > { %1060 = vmatpush3.bf16.msra.mxu1 %v1171_v55 }
 0x141   : > { %1061 = vmatprep.subr.bf16.mxu1 %v1291_v0 }
 0x144   : > { %1062 = vmatpush3.bf16.msra.mxu1 %v1172_v56 }
 0x145   : > { %1063 = vmatprep.subr.bf16.mxu1 %v1291_v0 }
 0x148   : > { %1064 = vmatpush3.bf16.msra.mxu1 %v1173_v58 }
 0x149   : > { %1065 = vmatprep.subr.bf16.mxu1 %v1291_v0 }
 0x14c   : > { %1066 = vmatpush3.bf16.msra.mxu1 %v1174_v60 }
 0x14f   : > { %1068 = vmatmul.mubr.bf16.vlgmr.msra.gmra.mrb[4].mxu1 %v682_v63 }
 0x1f8   : > { %v651_v1 = vpop.f32.mrb[4].mxu0 }
 0x1f9   : > { %v1049_v2 = vpop.f32.mrb[5].mxu0 }
 0x1fa   : > { %v654_v3 = vpop.f32.mrb[6].mxu0 }
 0x1fb   : > { %v1050_v4 = vpop.f32.mrb[7].mxu0 }
 0x202   : > { %v556_v5 = vpop.f32.mrb[0].mxu1 }
 0x203   : > { %v652_v6 = vadd.f32 %v651_v1, %v556_v5  ;;  %v1029_v7 = vpop.f32.mrb[1].mxu1 }
 0x204   : > { %v559_v8 = vpop.f32.mrb[2].mxu1 }
 0x205   : > { %v655_v9 = vadd.f32 %v654_v3, %v559_v8  ;;  %v1030_v10 = vpop.f32.mrb[3].mxu1 }
 0x222   : > { %v766_v0 = vpop.f32.mrb[4].mxu1 }
 0x223   : > { %v773_v12 = vadd.f32 %v766_v0, %v652_v6  ;;  %v1069_v13 = vpop.f32.mrb[5].mxu1 }
 0x224   : > { %v769_v14 = vpop.f32.mrb[6].mxu1 }
 0x225   : > { %v782_v15 = vadd.f32 %v948_v11, %v773_v12  ;;  %v774_v16 = vadd.f32 %v769_v14, %v655_v9  ;;  %v1070_v17 = vpop.f32.mrb[7].mxu1 }
 0x227   : > { %v783_v18 = vadd.f32 %v948_v11, %v774_v16  ;;  %v784_v19 = vmax.f32 %v782_v15, 0.0 }
 0x229   : > { %v785_v20 = vmax.f32 %v783_v18, 0.0 }
 0x22b   : > { %v973_v21 = vpack.c.bf16 %v785_v20, %v784_v19 }
 0x22d   : > { %974 = vst [vmem:[%s246_s12] sm:$0xff] %v973_v21  }
 0x22e   : > { %1217 = shalt.err (!%p1214_p6)
}
 0x22f   : > { %s1218_s17 = scalar_lea.hbm %s1468_s10, 128  ;;  %s1222_s27 = scalar_lea.hbm %s1523_s5, 256 }
 0x230   : > { %p1219_p7 = scmp.ne.s32.totalorder %s1468_s10, %s1218_s17  ;;  %p1223_p0 = scmp.lt.u32.totalorder %s1468_s10, %s1523_s5 }
 0x231   : > { %p1224_p2 = scmp.lt.u32.totalorder %s1222_s27, %s1218_s17  ;;  %p1226_p8 = scmp.lt.u32.totalorder %s1218_s17, %s1468_s10 }
 0x232   : > { %p1220_p9 = pnand %p1219_p7, %p1535_p10 }
 0x233   : > { %p1225_p4 = por %p1224_p2, %p1223_p0 }
 0x234   : > { %p1221_p12 = pneg %p1220_p9 }
 0x235   : > { %p1227_p11 = por %p1226_p8, %p1225_p4 }
 0x237   : > { %p1228_p13 = pnand %p1227_p11, %p1221_p12 }
 0x239   : > { %1231 = shalt.err (!%p1228_p13)
}
 0x23a   : > { %s1294_s12 = smov 64   ;;  %s1295_s13 = smov 4  }
 0x23b   : > { %1077 = dma.vmem_to_hbm [thread:$0]  (%p1535_p10), %s1470_s11, 128, %s1468_s10, %s1472_s7, %s1294_s12, %s1294_s12, %s1295_s13  }
 0x23c PF: > { %p1089_p1 = scmp.ge.s32.totalorder %s1286_s23, 2  ;;  %s827_s14 = sand.u32 1, %s1266_s18  }
 0x23d   : > { %p1536_p3 = scmp.ne.s32.totalorder %s1529_s30, 0  ;;  %s828_s15 = scalar_lea.sflag [#allocation5], %s827_s14 }
 0x23f   : > { %p1084_p5 = pnand %p1089_p1, %p1536_p3 }
 0x241   : > { %1261 = dma.done.wait (!%p1084_p5), %s828_s15, 128  }
 0x242   : > { %1263 = vsyncadd (!%p1084_p5), %s828_s15, 4294967168  ;;  %s19_s23 = sadd.s32 1, %s1286_s23   ;;  %s1537_s18 = smov %s1270_s19 }
 0x243   : > { %p16_p6 = scmp.ge.s32.totalorder %s19_s23, 4   ;;  %s1538_s19 = smov %s1274_s20 }
 0x244   : > { %s1539_s20 = smov %s1379_s6  ;;  %s1540_s21 = smov %s1282_s22 }
 0x245   : > { %s1541_s22 = smov %s1543_s26  ;;  %18 = sbr.rel (!%p16_p6) target bundleno = 5 (0x5), region = 91 }
 0x24c   :  { %833 = vsyncpa [#allocation4], 1 }
 0x24d   :  { %835 = vsyncpa [#allocation4 + $0x1], 1 }
 0x24e   :  { %836 = vsyncpa [#allocation5], 1 }
 0x24f   :  { %838 = vsyncpa [#allocation5 + $0x1], 1 }

</bundles_post_ra>
